<compile_context>
chip_gen: v7x
topology: tpu7x:2x2x1
jax: 0.10.0
libtpu: 0.0.40
codegen_flags: <defaults>
</compile_context>

<pallas_src>
import functools

import jax
import jax.numpy as jnp
from jax import lax
from jax.experimental import pallas as pl
from jax.experimental.pallas import tpu as pltpu


# ----------------------------------------------------------------------------
# Fused kernel: overlapping-patch conv (deep-K matmul) + bias + LayerNorm
# ----------------------------------------------------------------------------
def _patch_embed_ln_kernel(xg_ref, wq_ref, p_ref, o_ref, *, toh, wo, nq, eps):
    """One token-row tile of OverlapPatchEmbed.

    xg_ref: (1, Hg, Wg, s*s*Cin)   stride-grouped padded image, bf16 (resident per batch)
    wq_ref: (nq*nq*s*s*Cin, C)     conv weight, quadrants stacked along K, bf16 (resident)
    p_ref : (3, C)                 f32: row 0 = conv bias, row 1 = LN gamma, row 2 = LN beta
    o_ref : (1, M2, L)             output tokens for this tile (lane-dense store layout)
    """
    j = pl.program_id(1)
    row0 = j * toh
    feat = xg_ref.shape[-1]

    # Hoist the shared (toh + nq - 1) group-row window once; quadrant views are static
    # sub-slices of this value (adjacent quadrant windows overlap by toh - 1 rows).
    rows = xg_ref[0, pl.ds(row0, toh + nq - 1), :, :]          # (toh+nq-1, Wg, feat)

    # Deep-K LHS: concatenate the nq*nq quadrant slices along the contraction axis so a
    # single MXU matmul sees K = nq*nq*feat instead of nq*nq shallow K=feat matmuls.
    parts = []
    for dh in range(nq):                                        # static unroll
        for dw in range(nq):
            parts.append(rows[dh:dh + toh, dw:dw + wo, :].reshape(toh * wo, feat))
    lhs = jnp.concatenate(parts, axis=-1)                       # (toh*wo, nq*nq*feat) bf16

    acc = jnp.dot(lhs, wq_ref[...], preferred_element_type=jnp.float32)
    acc = acc + p_ref[0:1, :]                                   # conv bias (f32)

    # LayerNorm over channels, single pass (biased variance, PyTorch default eps), f32.
    mu = jnp.mean(acc, axis=-1, keepdims=True)
    ms = jnp.mean(acc * acc, axis=-1, keepdims=True)
    var = jnp.maximum(ms - mu * mu, 0.0)
    inv = lax.rsqrt(var + eps)
    y = (acc - mu) * inv * p_ref[1:2, :] + p_ref[2:3, :]

    # Lane-dense store: o_ref's trailing dims may repack C < 128 channels into 128 lanes.
    o_ref[0] = y.reshape(o_ref.shape[1], o_ref.shape[2]).astype(o_ref.dtype)


# ----------------------------------------------------------------------------
# Host-side helpers (layout plumbing only; all compute is in the kernel)
# ----------------------------------------------------------------------------
def _round_up(x, m):
    return -(-x // m) * m


def _vmem_tile_bytes(shape, itemsize):
    """Rough lane/sublane-padded VMEM footprint of one buffer holding `shape`."""
    shape = tuple(int(d) for d in shape)
    if not shape:
        return 4
    lead = 1
    for d in shape[:-2]:
        lead *= d
    m2 = shape[-2] if len(shape) >= 2 else 1
    m1 = shape[-1]
    sub = 8 * max(1, 4 // itemsize)          # f32 -> 8 sublanes, bf16 -> 16
    return lead * _round_up(m2, sub) * _round_up(m1, 128) * itemsize


def _pick_row_tile(ho, wo, cout, lane_pack, target_tokens):
    """Largest divisor of Ho whose output block stays (8,*)-legal and <= target tokens."""
    def minor2(d):  # second-minor dim of the stored output block
        return (d * wo * cout) // 128 if lane_pack else d * wo

    legal = [d for d in range(1, ho + 1)
             if ho % d == 0 and (minor2(d) % 8 == 0 or d == ho)]
    fit = [d for d in legal if d * wo <= target_tokens]
    if fit:
        return max(fit)
    return min(legal)       # smallest legal tile bounds VMEM; == ho only if unavoidable


def _regroup_weights(w_oihw, stride):
    """(Cout, Cin, k, k) conv weight -> (nq*nq*s*s*Cin, Cout) stride-quadrant matrix.

    Quadrant (dh, dw) holds taps (kh, kw) with kh//s == dh, kw//s == dw (zero-padded so
    every quadrant has the same s*s*Cin width), matching the stride-grouped input feature
    layout f = ph*s*Cin + pw*Cin + cin and the kernel's concat order q = dh*nq + dw.
    """
    cout, cin, k, k2 = w_oihw.shape
    assert k == k2, "square kernels only"
    s = stride
    nq = (k - 1) // s + 1
    w_hwio = jnp.transpose(w_oihw, (2, 3, 1, 0))              # (k, k, Cin, Cout)
    wq = jnp.zeros((nq, nq, s, s, cin, cout), w_hwio.dtype)
    for dh in range(nq):
        for dw in range(nq):
            h0, h1 = dh * s, min((dh + 1) * s, k)
            w0, w1 = dw * s, min((dw + 1) * s, k)
            wq = wq.at[dh, dw, :h1 - h0, :w1 - w0].set(w_hwio[h0:h1, w0:w1])
    return wq.reshape(nq * nq * s * s * cin, cout)


@functools.partial(jax.jit, static_argnames=("patch_size", "stride", "eps",
                                              "row_tile_tokens", "out_dtype"))
def overlap_patch_embed(x_nchw, w_conv, b_conv, ln_gamma, ln_beta, *,
                        patch_size=7, stride=4, eps=1e-5,
                        row_tile_tokens=2048, out_dtype=jnp.float32):
    """Fused OverlapPatchEmbed forward. Returns (tokens (B, Ho*Wo, C), Ho, Wo)."""
    assert patch_size > stride, "OverlapPatchEmbed requires patch_size > stride"
    B, cin, H, W = x_nchw.shape
    k, s = patch_size, stride
    pad = k // 2
    cout = w_conv.shape[0]
    ho = (H + 2 * pad - k) // s + 1
    wo = (W + 2 * pad - k) // s + 1
    nq = (k - 1) // s + 1
    hg = -(-(H + 2 * pad) // s)            # ceil(Hp/s) >= ho + nq - 1 groups
    wg = -(-(W + 2 * pad) // s)
    feat = s * s * cin
    kdim = nq * nq * feat

    # Conv zero-padding (+ round-up to a stride multiple), then stride-group
    # NCHW -> (B, Hg, Wg, s*s*Cin), bf16.  allow_input_fusion lets XLA fuse this layout
    # plumbing into the pallas_call input DMA instead of materializing it in HBM.
    # The overlapping im2col matrix itself is never materialized in HBM.
    xp = jnp.pad(x_nchw, ((0, 0), (0, 0),
                          (pad, hg * s - H - pad), (pad, wg * s - W - pad)))
    xg = xp.transpose(0, 2, 3, 1).reshape(B, hg, s, wg, s, cin)
    xg = xg.transpose(0, 1, 3, 2, 4, 5).reshape(B, hg, wg, feat).astype(jnp.bfloat16)

    wq = _regroup_weights(w_conv, s).astype(jnp.bfloat16)                 # (kdim, C)
    params = jnp.stack([b_conv, ln_gamma, ln_beta], 0).astype(jnp.float32)  # (3, C)

    # Output store layout: keep the stored last dim a multiple of 128 lanes if possible.
    lane_pack = (cout % 128 != 0) and ((wo * cout) % 128 == 0)
    toh = _pick_row_tile(ho, wo, cout, lane_pack, row_tile_tokens)
    tile_tok = toh * wo
    if lane_pack:
        out_block = (1, tile_tok * cout // 128, 128)
        out_shape = jax.ShapeDtypeStruct((B, ho * wo * cout // 128, 128), out_dtype)
    else:
        out_block = (1, tile_tok, cout)
        out_shape = jax.ShapeDtypeStruct((B, ho * wo, cout), out_dtype)

    # Scoped-VMEM budget from the actual lane-padded blocks (v5e scoped default is only
    # 16 MiB, v6e/v7x 32 MiB); pipeline double-buffers every BlockSpec'd operand.
    out_isz = jnp.dtype(out_dtype).itemsize
    resident = (2 * _vmem_tile_bytes((hg, wg, feat), 2)
                + 2 * _vmem_tile_bytes((kdim, cout), 2)
                + 2 * _vmem_tile_bytes((3, cout), 4)
                + 2 * _vmem_tile_bytes(out_block[1:], out_isz))
    working = 6 * _vmem_tile_bytes((tile_tok, max(kdim, cout)), 4)
    vmem_limit = int(min(max(2 * (resident + working), 32 * 2 ** 20), 100 * 2 ** 20))

    out = pl.pallas_call(
        functools.partial(_patch_embed_ln_kernel, toh=toh, wo=wo, nq=nq, eps=eps),
        grid=(B, ho // toh),
        in_specs=[
            # whole grouped image: same block index across j -> fetched once per batch elem
            pl.BlockSpec((1, hg, wg, feat), lambda b, j: (b, 0, 0, 0)),
            pl.BlockSpec((kdim, cout), lambda b, j: (0, 0)),      # resident weights
            pl.BlockSpec((3, cout), lambda b, j: (0, 0)),         # resident bias/gamma/beta
        ],
        out_specs=pl.BlockSpec(out_block, lambda b, j: (b, j, 0)),
        out_shape=out_shape,
        compiler_params=pltpu.CompilerParams(
            dimension_semantics=("parallel", "parallel"),  # no cross-step state; v7x 2 TCs
            allow_input_fusion=[0],
            vmem_limit_bytes=vmem_limit),
    )(xg, wq, params)

    if lane_pack:
        out = out.reshape(B, ho * wo, cout)                # free view back to (B, N, C)
    return out, ho, wo


# ----------------------------------------------------------------------------
# Pure-JAX reference (lax.conv + LayerNorm) for in-script verification
# ----------------------------------------------------------------------------
def overlap_patch_embed_reference(x_nchw, w_conv, b_conv, ln_gamma, ln_beta, *,
                                  patch_size=7, stride=4, eps=1e-5):
    pad = patch_size // 2
    y = lax.conv_general_dilated(
        x_nchw, w_conv, window_strides=(stride, stride),
        padding=((pad, pad), (pad, pad)),
        dimension_numbers=("NCHW", "OIHW", "NCHW"),
        precision=lax.Precision.HIGHEST)
    y = y + b_conv[None, :, None, None]
    B, C, Ho, Wo = y.shape
    t = y.reshape(B, C, Ho * Wo).transpose(0, 2, 1)               # (B, N, C)
    mu = jnp.mean(t, axis=-1, keepdims=True)
    var = jnp.mean((t - mu) ** 2, axis=-1, keepdims=True)
    t = (t - mu) / jnp.sqrt(var + eps) * ln_gamma + ln_beta
    return t, Ho, Wo


# ----------------------------------------------------------------------------
if __name__ == "__main__":
    def run_case(key, B, Cin, H, W, C, patch_size=7, stride=4, row_tile_tokens=2048):
        kx, kw, kb, kg, kbe = jax.random.split(key, 5)
        x = jax.random.normal(kx, (B, Cin, H, W), jnp.float32)
        w = jax.random.normal(kw, (C, Cin, patch_size, patch_size), jnp.float32) * 0.02
        b = jax.random.normal(kb, (C,), jnp.float32) * 0.02
        g = 1.0 + 0.1 * jax.random.normal(kg, (C,), jnp.float32)
        beta = 0.1 * jax.random.normal(kbe, (C,), jnp.float32)

        out, Ho, Wo = overlap_patch_embed(
            x, w, b, g, beta, patch_size=patch_size, stride=stride,
            row_tile_tokens=row_tile_tokens)
        out = jax.block_until_ready(out)

        ref, Ho_r, Wo_r = overlap_patch_embed_reference(
            x, w, b, g, beta, patch_size=patch_size, stride=stride)
        assert int(Ho) == Ho_r and int(Wo) == Wo_r, (int(Ho), int(Wo), Ho_r, Wo_r)
        assert out.shape == (B, Ho_r * Wo_r, C), out.shape
        assert bool(jnp.all(jnp.isfinite(out)))
        max_err = float(jnp.max(jnp.abs(out - ref)))
        mean_err = float(jnp.mean(jnp.abs(out - ref)))
        # bf16-streamed inputs with f32 accumulation/LayerNorm -> small drift vs f32 ref.
        assert max_err < 8e-2 and mean_err < 1e-2, (max_err, mean_err)

    keys = jax.random.split(jax.random.PRNGKey(0), 3)
    # lane-dense embed dim (C = 128), k=7/s=4/p=3 overlapping patches, single row tile
    run_case(keys[0], B=2, Cin=3, H=16, W=16, C=128)
    # multiple row tiles (grid j > 1) exercising the hoisted dynamic row window
    run_case(keys[1], B=1, Cin=3, H=32, W=32, C=128, row_tile_tokens=32)
    # rectangular image, C = 64 < 128 -> lane-packed (128-wide) output store path
    run_case(keys[2], B=1, Cin=3, H=48, W=40, C=64, row_tile_tokens=64)

    print("KERNEL_OK")
</pallas_src>

<mosaic_0001>
module attributes {stable_mosaic.version = 11 : i64} {
  func.func @_patch_embed_ln_kernel(%arg0: i32, %arg1: i32, %arg2: memref<1x6x6x48xbf16, #tpu.memory_space<vmem>>, %arg3: memref<192x128xbf16, #tpu.memory_space<vmem>>, %arg4: memref<3x128xf32, #tpu.memory_space<vmem>>, %arg5: memref<1x16x128xf32, #tpu.memory_space<vmem>>) attributes {dimension_semantics = [#tpu.dimension_semantics<parallel>, #tpu.dimension_semantics<parallel>], iteration_bounds = array<i64: 2, 1>, scalar_prefetch = 0 : i64, scratch_operands = 0 : i64, tpu.core_type = #tpu.core_type<tc>, window_params = [{transform_indices = @transform_0, window_bounds = array<i64: 1, 6, 6, 48>}, {pipeline_mode = #tpu.pipeline_mode<synchronous>, transform_indices = @transform_1, window_bounds = array<i64: 192, 128>}, {pipeline_mode = #tpu.pipeline_mode<synchronous>, transform_indices = @transform_2, window_bounds = array<i64: 3, 128>}, {transform_indices = @transform_3, window_bounds = array<i64: 1, 16, 128>}]} {
    %c4_i32 = arith.constant 4 : i32
    %0 = arith.muli %arg1, %c4_i32 : i32
    %c0 = arith.constant 0 : index
    %1 = arith.index_cast %0 : i32 to index
    %c0_0 = arith.constant 0 : index
    %c0_1 = arith.constant 0 : index
    %2 = vector.load %arg2[%c0, %1, %c0_0, %c0_1] : memref<1x6x6x48xbf16, #tpu.memory_space<vmem>>, vector<1x5x6x48xbf16>
    %3 = vector.shape_cast %2 : vector<1x5x6x48xbf16> to vector<5x6x48xbf16>
    %4 = vector.extract_strided_slice %3 {offsets = [0, 0, 0], sizes = [4, 4, 48], strides = [1, 1, 1]} : vector<5x6x48xbf16> to vector<4x4x48xbf16>
    %5 = vector.shape_cast %4 : vector<4x4x48xbf16> to vector<16x48xbf16>
    %6 = vector.extract_strided_slice %3 {offsets = [0, 1, 0], sizes = [4, 4, 48], strides = [1, 1, 1]} : vector<5x6x48xbf16> to vector<4x4x48xbf16>
    %7 = vector.shape_cast %6 : vector<4x4x48xbf16> to vector<16x48xbf16>
    %8 = vector.extract_strided_slice %3 {offsets = [1, 0, 0], sizes = [4, 4, 48], strides = [1, 1, 1]} : vector<5x6x48xbf16> to vector<4x4x48xbf16>
    %9 = vector.shape_cast %8 : vector<4x4x48xbf16> to vector<16x48xbf16>
    %10 = vector.extract_strided_slice %3 {offsets = [1, 1, 0], sizes = [4, 4, 48], strides = [1, 1, 1]} : vector<5x6x48xbf16> to vector<4x4x48xbf16>
    %11 = vector.shape_cast %10 : vector<4x4x48xbf16> to vector<16x48xbf16>
    %12 = tpu.concatenate %5, %7, %9, %11 in 1 : vector<16x48xbf16>, vector<16x48xbf16>, vector<16x48xbf16>, vector<16x48xbf16> -> vector<16x192xbf16>
    %c0_2 = arith.constant 0 : index
    %c0_3 = arith.constant 0 : index
    %13 = vector.load %arg3[%c0_2, %c0_3] : memref<192x128xbf16, #tpu.memory_space<vmem>>, vector<192x128xbf16>
    %cst = arith.constant dense<0.000000e+00> : vector<16x128xf32>
    %14 = tpu.matmul %12, %13, %cst {dimension_numbers = #tpu.dot_dimension_numbers<[1], [0], [0], [1], [0, 0, 1, 1], [], []>} : vector<16x192xbf16>, vector<192x128xbf16>, vector<16x128xf32> -> vector<16x128xf32>
    %c0_4 = arith.constant 0 : index
    %c0_5 = arith.constant 0 : index
    %15 = vector.load %arg4[%c0_4, %c0_5] : memref<3x128xf32, #tpu.memory_space<vmem>>, vector<1x128xf32>
    %16 = vector.broadcast %15 : vector<1x128xf32> to vector<16x128xf32>
    %17 = arith.addf %14, %16 : vector<16x128xf32>
    %cst_6 = arith.constant dense<0.000000e+00> : vector<16xf32>
    %18 = vector.multi_reduction <add>, %17, %cst_6 [1] : vector<16x128xf32> to vector<16xf32>
    %19 = vector.shape_cast %18 : vector<16xf32> to vector<16x1xf32>
    %cst_7 = arith.constant 1.280000e+02 : f32
    %20 = vector.broadcast %cst_7 : f32 to vector<16x1xf32>
    %21 = arith.divf %19, %20 : vector<16x1xf32>
    %22 = arith.mulf %17, %17 : vector<16x128xf32>
    %cst_8 = arith.constant dense<0.000000e+00> : vector<16xf32>
    %23 = vector.multi_reduction <add>, %22, %cst_8 [1] : vector<16x128xf32> to vector<16xf32>
    %24 = vector.shape_cast %23 : vector<16xf32> to vector<16x1xf32>
    %cst_9 = arith.constant 1.280000e+02 : f32
    %25 = vector.broadcast %cst_9 : f32 to vector<16x1xf32>
    %26 = arith.divf %24, %25 : vector<16x1xf32>
    %27 = arith.mulf %21, %21 : vector<16x1xf32>
    %28 = arith.subf %26, %27 : vector<16x1xf32>
    %cst_10 = arith.constant 0.000000e+00 : f32
    %29 = vector.broadcast %cst_10 : f32 to vector<16x1xf32>
    %30 = arith.maximumf %28, %29 : vector<16x1xf32>
    %cst_11 = arith.constant 9.99999974E-6 : f32
    %31 = vector.broadcast %cst_11 : f32 to vector<16x1xf32>
    %32 = arith.addf %30, %31 : vector<16x1xf32>
    %33 = math.rsqrt %32 : vector<16x1xf32>
    %34 = vector.broadcast %21 : vector<16x1xf32> to vector<16x128xf32>
    %35 = arith.subf %17, %34 : vector<16x128xf32>
    %36 = vector.broadcast %33 : vector<16x1xf32> to vector<16x128xf32>
    %37 = arith.mulf %35, %36 : vector<16x128xf32>
    %c1 = arith.constant 1 : index
    %c0_12 = arith.constant 0 : index
    %38 = vector.load %arg4[%c1, %c0_12] : memref<3x128xf32, #tpu.memory_space<vmem>>, vector<1x128xf32>
    %39 = vector.broadcast %38 : vector<1x128xf32> to vector<16x128xf32>
    %40 = arith.mulf %37, %39 : vector<16x128xf32>
    %c2 = arith.constant 2 : index
    %c0_13 = arith.constant 0 : index
    %41 = vector.load %arg4[%c2, %c0_13] : memref<3x128xf32, #tpu.memory_space<vmem>>, vector<1x128xf32>
    %42 = vector.broadcast %41 : vector<1x128xf32> to vector<16x128xf32>
    %43 = arith.addf %40, %42 : vector<16x128xf32>
    %c0_14 = arith.constant 0 : index
    %c0_15 = arith.constant 0 : index
    %c0_16 = arith.constant 0 : index
    %44 = vector.load %arg5[%c0_14, %c0_15, %c0_16] : memref<1x16x128xf32, #tpu.memory_space<vmem>>, vector<1x16x128xf32>
    %45 = vector.shape_cast %44 : vector<1x16x128xf32> to vector<16x128xf32>
    %46 = vector.shape_cast %43 : vector<16x128xf32> to vector<1x16x128xf32>
    tpu.vector_store %arg5[%c0_14, %c0_15, %c0_16], %46 {strides = array<i32>} : memref<1x16x128xf32, #tpu.memory_space<vmem>>, vector<1x16x128xf32>,
    return
  }
  func.func @transform_0(%arg0: i32, %arg1: i32) -> (i32, i32, i32, i32) {
    %c0_i32 = arith.constant 0 : i32
    %c0_i32_0 = arith.constant 0 : i32
    %c0_i32_1 = arith.constant 0 : i32
    %c0_i32_2 = arith.constant 0 : i32
    return %arg0, %c0_i32, %c0_i32_0, %c0_i32_1 : i32, i32, i32, i32
  }
  func.func @transform_1(%arg0: i32, %arg1: i32) -> (i32, i32) {
    %c0_i32 = arith.constant 0 : i32
    %c0_i32_0 = arith.constant 0 : i32
    %c0_i32_1 = arith.constant 0 : i32
    return %c0_i32, %c0_i32_0 : i32, i32
  }
  func.func @transform_2(%arg0: i32, %arg1: i32) -> (i32, i32) {
    %c0_i32 = arith.constant 0 : i32
    %c0_i32_0 = arith.constant 0 : i32
    %c0_i32_1 = arith.constant 0 : i32
    return %c0_i32, %c0_i32_0 : i32, i32
  }
  func.func @transform_3(%arg0: i32, %arg1: i32) -> (i32, i32, i32) {
    %c0_i32 = arith.constant 0 : i32
    %c0_i32_0 = arith.constant 0 : i32
    return %arg0, %arg1, %c0_i32 : i32, i32, i32
  }
}

</mosaic_0001>

<bundles_post_ra>
// kernel: overlap_patch_embed.1
= control target key start
LH: loop header
LB: loop body
LE: loop exit
PB: predicated region body
PF: predicated region fallthrough
CT: control target
= control target key end

     0   :  { %8 = vsyncpa [#allocation3], 0  ;;  %s1132_s0 = inlined_call_operand.vmem [shape: bf16[2,6,6,48], index: 0, kind: input, shape index: {}]   ;;  %s1133_s1 = inlined_call_operand.vmem [shape: bf16[192,128], index: 1, kind: input, shape index: {}]   ;;  %s1134_s2 = inlined_call_operand.vmem [shape: f32[3,128], index: 2, kind: input, shape index: {}]   ;;  %s1135_s3 = inlined_call_operand.hbm [shape: f32[2,16,128], index: 3, kind: output, shape index: {}]  }
   0x1   :  { %10 = vsyncpa [#allocation3 + $0x1], 0  ;;  %s901_s12 = smov 0   ;;  %s903_s13 = smov 0  }
   0x2   :  { %s905_s14 = smov 0   ;;  %s907_s15 = smov 0  }
   0x3   :  { %s909_s16 = smov 0   ;;  %s911_s17 = smov 0  }
   0x4 LB: > { %s681_s18 = sadd.s32 4294967295, %s871_s17   ;;  %s682_s19 = sadd.s32 4294967294, %s871_s17   ;;  %s871_s17 = sphi %s911_s17, %s16_s17   ;;  %s867_s16 = sphi %s909_s16, %s1144_s16   ;;  %s863_s15 = sphi %s907_s15, %s1143_s15   ;;  %s859_s14 = sphi %s905_s14, %s1142_s14   ;;  %s855_s13 = sphi %s903_s13, %s1141_s13   ;;  %s851_s12 = sphi %s901_s12, %s1140_s12  }
   0x5   : > { %s28_s20 = sadd.s32 1, %s867_s16  ;;  %s105_s21 = sadd.s32 1, %s859_s14 }
   0x6   : > { %p30_p0 = scmp.ge.s32.totalorder %s28_s20, 2  ;;  %p115_p1 = scmp.ne.s32.totalorder %s859_s14, %s855_s13 }
   0x7   : > { %p116_p2 = scmp.eq.s32.totalorder %s681_s18, 1  ;;  %p121_p3 = scmp.ne.s32.totalorder %s855_s13, %s851_s12 }
   0x8   : > { %s1146_s20 = smov (%p30_p0, %s28_s20), 0  ;;  %p122_p5 = scmp.eq.s32.totalorder %s682_s19, 1 }
   0x9   : > { %p941_p4 = por %p116_p2, %p115_p1  ;;  %s100_s23 = ssub.s32 %s867_s16, %s1146_s20 }
   0xa   : > { %p685_p6 = scmp.ge.s32.totalorder %s871_s17, 1  ;;  %p103_p7 = scmp.eq.s32.totalorder %s100_s23, 0 }
   0xb   : > { %p948_p8 = por %p122_p5, %p121_p3  ;;  %p154_p9 = scmp.lt.s32.totalorder %s871_s17, 3 }
   0xc   : > { %s954_s25 = scalar_select %p103_p7, %s859_s14, %s105_s21  }
   0xd   : > { %p155_p10 = pnand %p685_p6, %p154_p9 }
   0xe   : > { %p178_p11 = scmp.lt.s32.totalorder (!%p155_p10), %s863_s15, 1  ;;  %v200_v0 = vlaneseq (!%p155_p10)  ;;  %v873_v1 = vmov (!%p155_p10), 1983009808   ;;  %v775_v4 = vld [vmem:[%s1133_s1] sm:$0xff] (!%p155_p10)   ;;  %vm229_vm0 = vsmask.f32 (!%p155_p10), 1280 }
   0xf   : > { %158 = sbr.rel (%p155_p10) target bundleno = 574 (0x23e), region = 32  ;;  %v198_v2 = vunpack.c.l.s4 (!%p155_p10), %v873_v1  ;;  %v874_v6 = vmov (!%p155_p10), 0   ;;  %vm230_vm1 = vsmask.f32 (!%p155_p10), 3336  ;;  %v776_v7 = vld [vmem:[%s1133_s1 + $0x8] sm:$0xff] (!%p155_p10)   ;;  %v777_v9 = vld [vmem:[%s1133_s1 + $0x10] sm:$0xff] (!%p155_p10)  }
  0x10   : > { %v201_v3 = vshrl.u32 (!%p155_p10), %v200_v0, 7  ;;  %504 = vmatprep.subr.bf16.mxu0 (!%p155_p10), %v874_v6  ;;  %vm232_vm2 = vsmask.f32 (!%p155_p10), 5392  ;;  %vm234_vm3 = vsmask.f32 (!%p155_p10), 7448  ;;  %vm231_vm4 = vmor (!%p155_p10), %vm229_vm0, %vm230_vm1  ;;  %v778_v29 = vld [vmem:[%s1133_s1 + $0x18] sm:$0xff] (!%p155_p10)  }
  0x11   : > { %v199_v5 = vunpack.c.0.s8 (!%p155_p10), %v198_v2  ;;  %505 = vmatpush1.bf16.msra.mxu0 (!%p155_p10), %v775_v4  ;;  %vm233_vm5 = vmor (!%p155_p10), %vm231_vm4, %vm232_vm2  ;;  %v779_v50 = vld [vmem:[%s1133_s1 + $0x20] sm:$0xff] (!%p155_p10)   ;;  %s875_s30 = smov (!%p155_p10), 48   ;;  %s876_s6 = smov (!%p155_p10), 16   ;;  %vm389_vm7 = vcmask (!%p155_p10), 392192   ;;  %vm397_vm8 = vcmask (!%p155_p10), 130048   ;;  %vm393_vm9 = vcmask (!%p155_p10), 785408  }
  0x12   : > { %506 = vmatprep.subr.bf16.mxu0 (!%p155_p10), %v874_v6  ;;  %vm1005_vm6 = vmor (!%p155_p10), %vm233_vm5, %vm234_vm3  ;;  %vm501_vm10 = vcmask (!%p155_p10), 523264   ;;  %s709_s5 = sshll.u32 (!%p155_p10), %s863_s15, 8  ;;  %s878_s18 = smov (!%p155_p10), [#allocation2]  }
  0x13   : > { %v965_v8 = vsub.s32 (!%p155_p10), %v199_v5, %v201_v3  ;;  %v780_v3 = vld [vmem:[%s1133_s1 + $0x28] sm:$0xff] (!%p155_p10)   ;;  %s1082_s10 = scalar_lea.hbm (!%p155_p10), %s1135_s3, %s709_s5  ;;  %s797_s19 = sshll.u32 (!%p155_p10), %s878_s18, 4  ;;  %s798_s19 = int_to_ptr.vmem [resolvable:$false] %s797_s19 }
  0x14   : > { %s799_s21 = scalar_lea.vmem (!%p155_p10), %s798_s19, 512 }
  0x15   : > { %507 = vmatpush1.bf16.msra.mxu0 (!%p155_p10), %v776_v7 }
  0x16   : > { %s179_s26 = scalar_select %p178_p11, %s863_s15, 1  ;;  %508 = vmatprep.subr.bf16.mxu0 %v874_v6 }
  0x18   : > { %s710_s29 = smul.u32 24, %s179_s26  ;;  %s175_s26 = sand.u32 1, %s855_s13  }
  0x19   : > { %509 = vmatpush1.bf16.msra.mxu0 %v777_v9  ;;  %s686_s27 = sshll.u32 %s175_s26, 4  ;;  %s1086_s11 = scalar_lea.sflag [#allocation3], %s175_s26 }
  0x1a   : > { %s182_s7 = scalar_lea.vmem %s1132_s0, %s710_s29  ;;  %510 = vmatprep.subr.bf16.mxu0 %v874_v6 }
  0x1b   : > { %v974_v10 = vld [vmem:[%s182_s7] sm:$0x7]  ;;  %v976_v11 = vld [vmem:[%s182_s7 + $0x4] sm:$0x7]  ;;  %v978_v12 = vld [vmem:[%s182_s7 + $0x8] sm:$0x7] }
  0x1c   : > { %v980_v13 = vld [vmem:[%s182_s7 + $0xc] sm:$0x7]  ;;  %v203_v14 = vrot.slane %v974_v10, %v965_v8  ;;  %v211_v15 = vrot.slane %v976_v11, %v965_v8  ;;  %v219_v16 = vrot.slane %v978_v12, %v965_v8  ;;  %v988_v17 = vld [vmem:[%s182_s7 + $0x10] sm:$0x7]  ;;  %v315_v20 = vcombine.low %v974_v10, %v976_v11  ;;  %s877_s7 = smov 96  }
  0x1d   : > { %v227_v18 = vrot.slane %v980_v13, %v965_v8  ;;  %v299_v19 = vrot.slane %v988_v17, %v965_v8  ;;  %511 = vmatpush1.bf16.msra.mxu0 %v778_v29  ;;  %v351_v5 = vcombine.low %v976_v11, %v978_v12  ;;  %v352_v7 = vcombine.low %v980_v13, %v988_v17  ;;  %v782_v29 = vld [vmem:[%s1133_s1 + $0x38] sm:$0xff]  }
  0x1e   : > { %v204_v21 = vcombine.high %v203_v14, %v203_v14  ;;  %v212_v22 = vcombine.high %v211_v15, %v211_v15  ;;  %v220_v23 = vcombine.high %v219_v16, %v219_v16  ;;  %v237_v24 = vshrl.u32 %v203_v14, 16  ;;  %512 = vmatprep.subr.bf16.mxu0 %v874_v6 }
  0x1f   : > { %v228_v25 = vcombine.high %v227_v18, %v227_v18  ;;  %v240_v26 = vshll.u32 %v203_v14, 16  ;;  %v251_v27 = vshrl.u32 %v211_v15, 16  ;;  %v254_v28 = vshll.u32 %v211_v15, 16 }
  0x20   : > { %v239_v30 = vrot.slane %v237_v24, 6  ;;  %v246_v31 = vshll.u32 %v204_v21, 16  ;;  %v260_v32 = vshll.u32 %v212_v22, 16  ;;  %v265_v33 = vshrl.u32 %v219_v16, 16 }
  0x21   : > { %v242_v34 = vrot.slane %v240_v26, 7  ;;  %v253_v35 = vrot.slane %v251_v27, 6  ;;  %v256_v36 = vrot.slane %v254_v28, 7  ;;  %v268_v37 = vshll.u32 %v219_v16, 16  ;;  %513 = vmatpush1.bf16.msra.mxu0 %v779_v50 }
  0x22   : > { %v248_v38 = vrot.slane %v246_v31, 7  ;;  %v262_v39 = vrot.slane %v260_v32, 7  ;;  %v267_v40 = vrot.slane %v265_v33, 6  ;;  %v274_v41 = vshll.u32 %v220_v23, 16  ;;  %514 = vmatprep.subr.bf16.mxu0 %v874_v6  ;;  %v781_v23 = vld [vmem:[%s1133_s1 + $0x30] sm:$0xff]  }
  0x23   : > { %v243_v42 = vor.u32 %v242_v34, %v239_v30  ;;  %v257_v43 = vor.u32 %v256_v36, %v253_v35  ;;  %v270_v44 = vrot.slane %v268_v37, 7  ;;  %v279_v45 = vshrl.u32 %v227_v18, 16  ;;  %v783_v34 = vld [vmem:[%s1133_s1 + $0x40] sm:$0xff]   ;;  %v785_v35 = vld [vmem:[%s1133_s1 + $0x50] sm:$0xff]   ;;  %v788_v36 = vld [vmem:[%s1133_s1 + $0x58] sm:$0xff]  }
  0x24   : > { %v282_v47 = vshll.u32 %v227_v18, 16  ;;  %v288_v48 = vshll.u32 %v228_v25, 16  ;;  %v300_v49 = vcombine.high %v299_v19, %v299_v19  ;;  %v276_v55 = vrot.slane %v274_v41, 7 }
  0x25   : > { %v244_v51 = vrot.slane %v243_v42, 2  ;;  %v258_v52 = vrot.slane %v257_v43, 2  ;;  %v271_v53 = vor.u32 %v270_v44, %v267_v40  ;;  %v281_v54 = vrot.slane %v279_v45, 6  ;;  %515 = vmatpush1.bf16.msra.mxu0 %v780_v3  ;;  %v688_v43 = vld [vmem:[%s1134_s2] ss:$0 sm:$0xff] }
  0x26   : > { %v284_v56 = vrot.slane %v282_v47, 7  ;;  %v302_v57 = vshrl.u32 %v299_v19, 16  ;;  %v305_v58 = vshll.u32 %v299_v19, 16  ;;  %v311_v62 = vshll.u32 %v300_v49, 16  ;;  %516 = vmatprep.subr.bf16.mxu0 %v874_v6 }
  0x27   : > { %v249_v59 = vsel %vm1005_vm6, %v244_v51, %v248_v38  ;;  %v263_v60 = vsel %vm1005_vm6, %v258_v52, %v262_v39  ;;  %v272_v61 = vrot.slane %v271_v53, 2  ;;  %v290_v0 = vrot.slane %v288_v48, 7 }
  0x28   : > { %v285_v63 = vor.u32 %v284_v56, %v281_v54  ;;  %v304_v1 = vrot.slane %v302_v57, 6  ;;  %v307_v2 = vrot.slane %v305_v58, 7  ;;  %v332_v4 = vcombine.low %v249_v59, %v263_v60 }
  0x29   : > { %v277_v9 = vsel %vm1005_vm6, %v272_v61, %v276_v55  ;;  %v313_v16 = vrot.slane %v311_v62, 7  ;;  %v316_v19 = vcombine.low %v978_v12, %v980_v13  ;;  %v323_v21 = vrot.slane %v315_v20, %v965_v8  ;;  %517 = vmatpush1.bf16.msra.mxu0 %v781_v23 }
  0x2a   : > { %v286_v14 = vrot.slane %v285_v63, 2  ;;  %v308_v15 = vor.u32 %v307_v2, %v304_v1  ;;  %v370_v18 = vcombine.low %v263_v60, %v277_v9  ;;  %v340_v25 = vrot.slane %v332_v4, %v965_v8  ;;  %518 = vmatprep.subr.bf16.mxu0 %v874_v6 }
  0x2b   : > { %v330_v12 = vrot.slane %v316_v19, %v965_v8  ;;  %v359_v11 = vrot.slane %v351_v5, %v965_v8  ;;  %v366_v13 = vrot.slane %v352_v7, %v965_v8  ;;  %v702_v5 = vld [vmem:[%s1134_s2 + $0x1] ss:$0 sm:$0xff] }
  0x2c   : > { %v291_v17 = vsel %vm1005_vm6, %v286_v14, %v290_v0  ;;  %v309_v22 = vrot.slane %v308_v15, 2  ;;  %v378_v27 = vrot.slane %v370_v18, %v965_v8  ;;  %v703_v15 = vld [vmem:[%s1134_s2 + $0x2] ss:$0 sm:$0xff] }
  0x2d   : > { %v333_v24 = vcombine.low %v277_v9, %v291_v17  ;;  %v331_v28 = vcombine.low %v323_v21, %v330_v12  ;;  %v367_v33 = vcombine.low %v359_v11, %v366_v13  ;;  %519 = vmatpush1.bf16.msra.mxu0 %v782_v29 }
  0x2e   : > { %v314_v10 = vsel %vm1005_vm6, %v309_v22, %v313_v16  ;;  %520 = vmatprep.subr.bf16.mxu0 %v874_v6 }
  0x2f   : > { %v347_v20 = vrot.slane %v333_v24, %v965_v8  ;;  %v371_v26 = vcombine.low %v291_v17, %v314_v10 }
  0x31   : > { %v348_v30 = vcombine.low %v340_v25, %v347_v20  ;;  %v385_v31 = vrot.slane %v371_v26, %v965_v8  ;;  %521 = vmatpush1.bf16.msra.mxu0 %v783_v34  ;;  %v784_v8 = vld [vmem:[%s1133_s1 + $0x48] sm:$0xff]  }
  0x32   : > { %522 = vmatprep.subr.bf16.mxu0 %v874_v6 }
  0x33   : > { %349 = vrot.lane.b32.xlu0 %v348_v30, %s875_s30  ;;  %v386_v32 = vcombine.low %v378_v27, %v385_v31 }
  0x35   : > { %387 = vrot.lane.b32.xlu1 %v386_v32, %s876_s6  ;;  %523 = vmatpush1.bf16.msra.mxu0 %v784_v8  ;;  %s177_s6 = scalar_lea.vmem [#allocation2], %s686_s27 }
  0x36   : > { %524 = vmatprep.subr.bf16.mxu0 %v874_v6 }
  0x37   : > { %368 = vrot.lane.b32.xlu0 %v367_v33, %s877_s7  ;;  %s606_s7 = sshll.u32 %s177_s6, 4  ;;  %s1084_s7 = int_to_ptr.vmem [resolvable:$true] %s606_s7 }
  0x38   : > { %s793_s15 = scalar_lea.vmem %s1084_s7, 256  ;;  %p800_p1 = scmp.lt.s32.totalorder %s1084_s7, %s798_s19 }
  0x39   : > { %525 = vmatpush1.bf16.msra.mxu0 %v785_v35  ;;  %p794_p12 = scmp.ne.s32.totalorder %s1084_s7, %s793_s15  ;;  %p801_p2 = scmp.lt.s32.totalorder %s799_s21, %s793_s15 }
  0x3a   : > { %526 = vmatprep.subr.bf16.mxu0 %v874_v6 }
  0x3b   : > { %p795_p13 = pnand %p794_p12, %p941_p4  ;;  %p802_p3 = por %p801_p2, %p800_p1 }
  0x3d   : > { %527 = vmatpush1.bf16.msra.mxu0 %v788_v36  ;;  %p796_p0 = pneg %p795_p13 }
  0x3f   : > { %p803_p5 = pnand %p802_p3, %p796_p0 }
  0xa5   : > { %v350_v37 = vpop.permute.xlu0 %349 }
  0xa6   : > { %v392_v39 = vsel %vm389_vm7, %v331_v28, %v350_v37 }
  0xa7   : > { %v388_v38 = vpop.permute.xlu1 %387 }
  0xa9   : > { %v369_v40 = vpop.permute.xlu0 %368 }
  0xaa   : > { %v399_v41 = vsel %vm397_vm8, %v369_v40, %v388_v38  ;;  %v395_v42 = vsel %vm393_vm9, %v392_v39, %v369_v40 }
  0xab   : > { %701 = vmatprep.mubr.msk.bf16.mxu0 %vm501_vm10, %v399_v41 }
  0xac   : > { %537 = vmatmul.mubr.bf16.vlgmr.msra.gmra.mrb[0].mxu0 %v395_v42 }
 0x17f   : > { %v538_v44 = vpop.f32.mrb[0].mxu0 }
 0x180   : > { %v539_v45 = vadd.f32 %v688_v43, %v538_v44  ;;  %v540_v6 = vpop.f32.mrb[1].mxu0 }
 0x181   : > { %v541_v46 = vpop.f32.mrb[2].mxu0 }
 0x182   : > { %v542_v47 = vadd.f32 %v688_v43, %v541_v46  ;;  %v543_v48 = vpop.f32.mrb[3].mxu0  ;;  %545 = vadd.xlane.f32.xlu1 %v539_v45  ;;  %v552_v50 = vmul.f32 %v539_v45, %v539_v45 }
 0x184   : > { %547 = vadd.xlane.f32.xlu0 %v542_v47  ;;  %v553_v49 = vmul.f32 %v542_v47, %v542_v47 }
 0x186   : > { %556 = vadd.xlane.f32.xlu1 %v553_v49 }
 0x188   : > { %554 = vadd.xlane.f32.xlu0 %v552_v50 }
 0x20f   : > { %v546_v51 = vpop.xlane.xlu1 %545 }
 0x210   : > { %v550_v53 = vmul.f32 0.0078125, %v546_v51 }
 0x211   : > { %v548_v52 = vpop.xlane.xlu0 %547 }
 0x212   : > { %v551_v54 = vmul.f32 0.0078125, %v548_v52  ;;  %v560_v59 = vmul.f32 %v550_v53, %v550_v53  ;;  %v570_v7 = vsub.f32 %v539_v45, %v550_v53 }
 0x213   : > { %v557_v55 = vpop.xlane.xlu1 %556 }
 0x214   : > { %v561_v56 = vmul.f32 %v551_v54, %v551_v54  ;;  %v559_v57 = vmul.f32 0.0078125, %v557_v55  ;;  %v571_v3 = vsub.f32 %v542_v47, %v551_v54 }
 0x215   : > { %v555_v58 = vpop.xlane.xlu0 %554 }
 0x216   : > { %v563_v60 = vsub.f32 %v559_v57, %v561_v56  ;;  %v558_v61 = vmul.f32 0.0078125, %v555_v58 }
 0x218   : > { %v565_v62 = vmax.f32 %v563_v60, 0.0  ;;  %v562_v63 = vsub.f32 %v558_v61, %v560_v59 }
 0x21a   : > { %v567_v0 = vadd.f32 1e-05, %v565_v62  ;;  %v564_v1 = vmax.f32 %v562_v63, 0.0 }
 0x21c   : > { %789 = vrsqrt.f32 %v567_v0  ;;  %v566_v2 = vadd.f32 1e-05, %v564_v1 }
 0x21e   : > { %791 = vrsqrt.f32 %v566_v2 }
 0x226   : > { %v790_v4 = vpop.eup %789 }
 0x227   : > { %v573_v9 = vmul.f32 %v790_v4, %v571_v3 }
 0x228   : > { %v792_v14 = vpop.eup %791 }
 0x229   : > { %v572_v16 = vmul.f32 %v792_v14, %v570_v7  ;;  %v580_v18 = vmul.f32 %v702_v5, %v573_v9 }
 0x22b   : > { %v579_v19 = vmul.f32 %v702_v5, %v572_v16  ;;  %v587_v21 = vadd.f32 %v703_v15, %v580_v18 }
 0x22d   : > { %v586_v17 = vadd.f32 %v703_v15, %v579_v19  ;;  %589 = vst [vmem:[%s177_s6 + $0x8] sm:$0xff] %v587_v21 }
 0x22f   : > { %588 = vst [vmem:[%s177_s6] sm:$0xff] %v586_v17 }
 0x230   : > { %806 = shalt.err (!%p803_p5)
}
 0x231   : > { %s807_s23 = scalar_lea.hbm %s1082_s10, 256  ;;  %s811_s28 = scalar_lea.hbm %s1135_s3, 512 }
 0x232   : > { %p808_p6 = scmp.ne.s32.totalorder %s1082_s10, %s807_s23  ;;  %p812_p10 = scmp.lt.u32.totalorder %s1082_s10, %s1135_s3 }
 0x233   : > { %p813_p11 = scmp.lt.u32.totalorder %s811_s28, %s807_s23  ;;  %p815_p13 = scmp.lt.u32.totalorder %s807_s23, %s1082_s10 }
 0x234   : > { %p809_p7 = pnand %p808_p6, %p941_p4 }
 0x235   : > { %p814_p12 = por %p813_p11, %p812_p10 }
 0x236   : > { %p810_p9 = pneg %p809_p7 }
 0x237   : > { %p816_p0 = por %p815_p13, %p814_p12 }
 0x239   : > { %p817_p1 = pnand %p816_p0, %p810_p9 }
 0x23b   : > { %820 = shalt.err (!%p817_p1)
}
 0x23c   : > { %s879_s4 = smov 128   ;;  %s880_s5 = smov 8  }
 0x23d   : > { %711 = dma.vmem_to_hbm [thread:$0]  (%p941_p4), %s1084_s7, 256, %s1082_s10, %s1086_s11, %s879_s4, %s879_s4, %s880_s5  }
 0x23e PF: > { %p717_p2 = scmp.ge.s32.totalorder %s871_s17, 2  ;;  %s621_s6 = sand.u32 1, %s851_s12  }
 0x23f   : > { %s622_s8 = scalar_lea.sflag [#allocation3], %s621_s6 }
 0x240   : > { %p714_p3 = pnand %p717_p2, %p948_p8 }
 0x242   : > { %846 = dma.done.wait (!%p714_p3), %s622_s8, 256  }
 0x243   : > { %848 = vsyncadd (!%p714_p3), %s622_s8, 4294967040  ;;  %s16_s17 = sadd.s32 1, %s871_s17   ;;  %s1140_s12 = smov %s855_s13 }
 0x244   : > { %p13_p5 = scmp.ge.s32.totalorder %s16_s17, 4   ;;  %s1141_s13 = smov %s859_s14 }
 0x245   : > { %s1142_s14 = smov %s954_s25  ;;  %s1143_s15 = smov %s867_s16 }
 0x246   : > { %s1144_s16 = smov %s1146_s20  ;;  %15 = sbr.rel (!%p13_p5) target bundleno = 4 (0x4), region = 68 }
 0x24d   :  { %627 = vsyncpa [#allocation3], 1 }
 0x24e   :  { %629 = vsyncpa [#allocation3 + $0x1], 1 }

</bundles_post_ra>
